<compile_context>
chip_gen: v7x
topology: tpu7x:2x2x1
jax: 0.10.0
libtpu: 0.0.40
codegen_flags: <defaults>
</compile_context>

<pallas_src>
import jax
import jax.numpy as jnp
from jax.experimental import pallas as pl
from jax.experimental.pallas import tpu as pltpu

FEAT = 128          # per-modality feature dim (classify_mri is Linear(128, num_classes))
NUM_CLASSES = 3     # get_args_multi().class_num stand-in
NC = NUM_CLASSES
HC = 2 * NC + 2     # per-modality packed-head columns: [cls_m (NC) | all-half (2) | classify-half (NC)]


def _mm_attention_vgg_kernel(x_ref, wb_ref, wh_ref, out_ref):
    # x_ref : [B, 2C, HW] f32     (x1 channels | x2 channels)
    # wb_ref: [2C, 2*FEAT] f32    block-diagonal backbone weight
    # wh_ref: [2*FEAT, 2*HC] f32  block-diagonal packed classifier heads
    # out_ref: [B, 3*NC] f32      [cls | cls_mri | cls_pet]

    # ---- GAP (f32 XLU lane reduce) + fused dual-backbone Linear (one MXU matmul) ----
    gap = jnp.mean(x_ref[...], axis=-1)                                   # [B, 2C]
    res = jnp.dot(gap, wb_ref[...], preferred_element_type=jnp.float32)   # [B, 2*FEAT] = [res1 | res2]

    # ---- one block-diagonal head matmul for BOTH modalities ----
    h = jnp.dot(res, wh_ref[...], preferred_element_type=jnp.float32)     # [B, 2*HC]
    cls_mri = h[:, 0:NC]                 # classify_mri(res1)
    cls_pet = h[:, HC:HC + NC]           # classify_pet(res2)
    logits = h[:, NC:NC + 2] + h[:, HC + NC:HC + NC + 2]   # == classify_all(concat(res1, res2))

    # ---- softmax over the 2 modality logits (f32, VPU/EUP) ----
    m = jnp.max(logits, axis=-1, keepdims=True)
    e = jnp.exp(logits - m)
    pred = e / jnp.sum(e, axis=-1, keepdims=True)          # [B, 2]

    # Per-row gate distributes through the bias-free final Linear:
    #   classify(concat(p0*res1, p1*res2)) == p0*(res1@Wc1) + p1*(res2@Wc2)
    cls = (pred[:, 0:1] * h[:, NC + 2:NC + 2 + NC]
           + pred[:, 1:2] * h[:, HC + NC + 2:HC + NC + 2 + NC])            # [B, NC]

    # ---- epilogue: direct column-slice stores (no in-kernel concat) ----
    out_ref[:, 0:NC] = cls
    out_ref[:, NC:2 * NC] = cls_mri
    out_ref[:, 2 * NC:3 * NC] = cls_pet


def prepare_params(params):
    """One-time host-side weight packing (NOT in the per-call hot path).

    `params` holds PyTorch-layout ([out_features, in_features]) bias-free weights:
      w_res1, w_res2       : [FEAT, C]      (GAP+Linear backbone stand-in)
      w_classify_mri/_pet  : [NC, FEAT]
      w_classify_all       : [2, 2*FEAT]
      w_classify           : [NC, 2*FEAT]
    """
    wb1 = params["w_res1"].T.astype(jnp.float32)   # [C, FEAT]
    wb2 = params["w_res2"].T.astype(jnp.float32)   # [C, FEAT]
    C = wb1.shape[0]

    # Block-diagonal backbone weight:  [gap1 | gap2] @ wb_bd == [res1 | res2]
    wb_bd = jnp.zeros((2 * C, 2 * FEAT), jnp.float32)
    wb_bd = wb_bd.at[:C, :FEAT].set(wb1).at[C:, FEAT:].set(wb2)

    w_all_t = params["w_classify_all"].T.astype(jnp.float32)   # [2*FEAT, 2]
    w_cls_t = params["w_classify"].T.astype(jnp.float32)       # [2*FEAT, NC]
    wh1 = jnp.concatenate(
        [params["w_classify_mri"].T.astype(jnp.float32), w_all_t[:FEAT], w_cls_t[:FEAT]],
        axis=1)                                                # [FEAT, HC]
    wh2 = jnp.concatenate(
        [params["w_classify_pet"].T.astype(jnp.float32), w_all_t[FEAT:], w_cls_t[FEAT:]],
        axis=1)                                                # [FEAT, HC]

    # Block-diagonal head weight:  [res1 | res2] @ wh_bd == [h1 | h2]
    wh_bd = jnp.zeros((2 * FEAT, 2 * HC), jnp.float32)
    wh_bd = wh_bd.at[:FEAT, :HC].set(wh1).at[FEAT:, HC:].set(wh2)

    return {"wb": wb_bd, "wh": wh_bd}


@jax.jit
def multi_model_attention_vgg(x1, x2, prep):
    """x1, x2: [B, C, H, W] float32 (NCHW).  Returns (cls, cls_mri, cls_pet)."""
    B, C, H, W = x1.shape
    HW = H * W
    # Small copy fusion: pack both modalities into ONE kernel input (halves the
    # number of input DMA descriptors); reshape itself is a free bitcast.
    x_packed = jnp.concatenate(
        [x1.reshape(B, C, HW), x2.reshape(B, C, HW)], axis=1)   # [B, 2C, HW] f32

    vmem = pl.BlockSpec(memory_space=pltpu.MemorySpace.VMEM)
    # No grid: whole problem is one tiny block; total VMEM footprint ~56 KiB on
    # all generations (v5e/v6e/v7x), so no vmem_limit_bytes needed.
    packed = pl.pallas_call(
        _mm_attention_vgg_kernel,
        out_shape=jax.ShapeDtypeStruct((B, 3 * NC), jnp.float32),
        in_specs=[vmem, vmem, vmem],
        out_specs=vmem,
    )(x_packed, prep["wb"], prep["wh"])

    return packed[:, :NC], packed[:, NC:2 * NC], packed[:, 2 * NC:]


def _reference(x1, x2, params):
    """Pure-JAX f32 reference mirroring the PyTorch forward (state == 2)."""
    g1 = jnp.mean(x1, axis=(2, 3))
    g2 = jnp.mean(x2, axis=(2, 3))
    res1 = g1 @ params["w_res1"].T
    res2 = g2 @ params["w_res2"].T
    cls_mri = res1 @ params["w_classify_mri"].T
    cls_pet = res2 @ params["w_classify_pet"].T
    res = jnp.concatenate([res1, res2], axis=1)
    logits = res @ params["w_classify_all"].T
    pred = jax.nn.softmax(logits, axis=-1)
    out = jnp.concatenate([pred[:, 0, None] * res1, pred[:, 1, None] * res2], axis=1)
    cls = out @ params["w_classify"].T
    return cls, cls_mri, cls_pet


if __name__ == "__main__":
    B, C, H, W = 2, 4, 16, 16
    key = jax.random.PRNGKey(0)
    k = jax.random.split(key, 8)

    x1 = jax.random.normal(k[0], (B, C, H, W), jnp.float32)
    x2 = jax.random.normal(k[1], (B, C, H, W), jnp.float32)

    params = {
        # PyTorch Linear layout: [out_features, in_features], bias=False.
        "w_res1":         0.05 * jax.random.normal(k[2], (FEAT, C), jnp.float32),
        "w_res2":         0.05 * jax.random.normal(k[3], (FEAT, C), jnp.float32),
        "w_classify_mri": 0.05 * jax.random.normal(k[4], (NC, FEAT), jnp.float32),
        "w_classify_pet": 0.05 * jax.random.normal(k[5], (NC, FEAT), jnp.float32),
        "w_classify_all": 0.05 * jax.random.normal(k[6], (2, 2 * FEAT), jnp.float32),
        "w_classify":     0.05 * jax.random.normal(k[7], (NC, 2 * FEAT), jnp.float32),
    }

    prep = prepare_params(params)   # one-time block-diagonal weight packing
    cls, cls_mri, cls_pet = jax.block_until_ready(
        multi_model_attention_vgg(x1, x2, prep))

    ref_cls, ref_mri, ref_pet = _reference(x1, x2, params)
    # Full f32 path (in-kernel f32 GAP, f32 MXU accumulation) -> tight tolerances.
    assert jnp.allclose(cls, ref_cls, atol=1e-4, rtol=1e-3)
    assert jnp.allclose(cls_mri, ref_mri, atol=1e-4, rtol=1e-3)
    assert jnp.allclose(cls_pet, ref_pet, atol=1e-4, rtol=1e-3)

    print("KERNEL_OK")
</pallas_src>

<mosaic_0001>
module attributes {stable_mosaic.version = 11 : i64} {
  func.func @_mm_attention_vgg_kernel(%arg0: memref<2x8x256xf32, #tpu.memory_space<vmem>>, %arg1: memref<8x256xf32, #tpu.memory_space<vmem>>, %arg2: memref<256x16xf32, #tpu.memory_space<vmem>>, %arg3: memref<2x9xf32, #tpu.memory_space<vmem>>) attributes {dimension_semantics = [], scalar_prefetch = 0 : i64, scratch_operands = 0 : i64, tpu.core_type = #tpu.core_type<tc>} {
    %c0 = arith.constant 0 : index
    %c0_0 = arith.constant 0 : index
    %c0_1 = arith.constant 0 : index
    %0 = vector.load %arg0[%c0, %c0_0, %c0_1] : memref<2x8x256xf32, #tpu.memory_space<vmem>>, vector<2x8x256xf32>
    %cst = arith.constant dense<0.000000e+00> : vector<2x8xf32>
    %1 = vector.multi_reduction <add>, %0, %cst [2] : vector<2x8x256xf32> to vector<2x8xf32>
    %cst_2 = arith.constant 2.560000e+02 : f32
    %2 = vector.broadcast %cst_2 : f32 to vector<2x8xf32>
    %3 = arith.divf %1, %2 : vector<2x8xf32>
    %c0_3 = arith.constant 0 : index
    %c0_4 = arith.constant 0 : index
    %4 = vector.load %arg1[%c0_3, %c0_4] : memref<8x256xf32, #tpu.memory_space<vmem>>, vector<8x256xf32>
    %cst_5 = arith.constant dense<0.000000e+00> : vector<2x256xf32>
    %5 = tpu.matmul %3, %4, %cst_5 {dimension_numbers = #tpu.dot_dimension_numbers<[1], [0], [0], [1], [0, 0, 1, 1], [], []>} : vector<2x8xf32>, vector<8x256xf32>, vector<2x256xf32> -> vector<2x256xf32>
    %c0_6 = arith.constant 0 : index
    %c0_7 = arith.constant 0 : index
    %6 = vector.load %arg2[%c0_6, %c0_7] : memref<256x16xf32, #tpu.memory_space<vmem>>, vector<256x16xf32>
    %cst_8 = arith.constant dense<0.000000e+00> : vector<2x16xf32>
    %7 = tpu.matmul %5, %6, %cst_8 {dimension_numbers = #tpu.dot_dimension_numbers<[1], [0], [0], [1], [0, 0, 1, 1], [], []>} : vector<2x256xf32>, vector<256x16xf32>, vector<2x16xf32> -> vector<2x16xf32>
    %8 = vector.extract_strided_slice %7 {offsets = [0, 0], sizes = [2, 3], strides = [1, 1]} : vector<2x16xf32> to vector<2x3xf32>
    %9 = vector.extract_strided_slice %7 {offsets = [0, 8], sizes = [2, 3], strides = [1, 1]} : vector<2x16xf32> to vector<2x3xf32>
    %10 = vector.extract_strided_slice %7 {offsets = [0, 3], sizes = [2, 2], strides = [1, 1]} : vector<2x16xf32> to vector<2x2xf32>
    %11 = vector.extract_strided_slice %7 {offsets = [0, 11], sizes = [2, 2], strides = [1, 1]} : vector<2x16xf32> to vector<2x2xf32>
    %12 = arith.addf %10, %11 : vector<2x2xf32>
    %cst_9 = arith.constant dense<0xFF800000> : vector<2xf32>
    %13 = vector.multi_reduction <maximumf>, %12, %cst_9 [1] : vector<2x2xf32> to vector<2xf32>
    %14 = vector.shape_cast %13 : vector<2xf32> to vector<2x1xf32>
    %15 = vector.broadcast %14 : vector<2x1xf32> to vector<2x2xf32>
    %16 = arith.subf %12, %15 : vector<2x2xf32>
    %17 = math.exp %16 : vector<2x2xf32>
    %cst_10 = arith.constant dense<0.000000e+00> : vector<2xf32>
    %18 = vector.multi_reduction <add>, %17, %cst_10 [1] : vector<2x2xf32> to vector<2xf32>
    %19 = vector.shape_cast %18 : vector<2xf32> to vector<2x1xf32>
    %20 = vector.broadcast %19 : vector<2x1xf32> to vector<2x2xf32>
    %21 = arith.divf %17, %20 : vector<2x2xf32>
    %22 = vector.extract_strided_slice %21 {offsets = [0, 0], sizes = [2, 1], strides = [1, 1]} : vector<2x2xf32> to vector<2x1xf32>
    %23 = vector.extract_strided_slice %7 {offsets = [0, 5], sizes = [2, 3], strides = [1, 1]} : vector<2x16xf32> to vector<2x3xf32>
    %24 = vector.broadcast %22 : vector<2x1xf32> to vector<2x3xf32>
    %25 = arith.mulf %24, %23 : vector<2x3xf32>
    %26 = vector.extract_strided_slice %21 {offsets = [0, 1], sizes = [2, 1], strides = [1, 1]} : vector<2x2xf32> to vector<2x1xf32>
    %27 = vector.extract_strided_slice %7 {offsets = [0, 13], sizes = [2, 3], strides = [1, 1]} : vector<2x16xf32> to vector<2x3xf32>
    %28 = vector.broadcast %26 : vector<2x1xf32> to vector<2x3xf32>
    %29 = arith.mulf %28, %27 : vector<2x3xf32>
    %30 = arith.addf %25, %29 : vector<2x3xf32>
    %c0_11 = arith.constant 0 : index
    %c0_12 = arith.constant 0 : index
    %31 = vector.load %arg3[%c0_11, %c0_12] : memref<2x9xf32, #tpu.memory_space<vmem>>, vector<2x3xf32>
    tpu.vector_store %arg3[%c0_11, %c0_12], %30 {strides = array<i32>} : memref<2x9xf32, #tpu.memory_space<vmem>>, vector<2x3xf32>,
    %c0_13 = arith.constant 0 : index
    %c3 = arith.constant 3 : index
    %32 = vector.load %arg3[%c0_13, %c3] : memref<2x9xf32, #tpu.memory_space<vmem>>, vector<2x3xf32>
    tpu.vector_store %arg3[%c0_13, %c3], %8 {strides = array<i32>} : memref<2x9xf32, #tpu.memory_space<vmem>>, vector<2x3xf32>,
    %c0_14 = arith.constant 0 : index
    %c6 = arith.constant 6 : index
    %33 = vector.load %arg3[%c0_14, %c6] : memref<2x9xf32, #tpu.memory_space<vmem>>, vector<2x3xf32>
    tpu.vector_store %arg3[%c0_14, %c6], %9 {strides = array<i32>} : memref<2x9xf32, #tpu.memory_space<vmem>>, vector<2x3xf32>,
    return
  }
}

</mosaic_0001>

<bundles_post_ra>
// kernel: multi_model_attention_vgg.1
= control target key start
LH: loop header
LB: loop body
LE: loop exit
PB: predicated region body
PF: predicated region fallthrough
CT: control target
= control target key end

     0   :  { %v360_v8 = vmov 0.0   ;;  %v31_v54 = vlaneseq  ;;  %vm41_vm0 = vcmask 1041409   ;;  %vm43_vm1 = vcmask 64512   ;;  %s361_s29 = smov 120   ;;  %s365_s30 = smov 3   ;;  %s513_s0 = inlined_call_operand.vmem [shape: f32[2,8,256], index: 0, kind: input, shape index: {}]   ;;  %s514_s1 = inlined_call_operand.vmem [shape: f32[8,256], index: 1, kind: input, shape index: {}]   ;;  %s515_s2 = inlined_call_operand.vmem [shape: f32[256,16], index: 2, kind: input, shape index: {}]   ;;  %s516_s3 = inlined_call_operand.vmem [shape: f32[2,9], index: 3, kind: output, shape index: {}]  }
   0x1   :  { %v14_v0 = vld [vmem:[%s513_s0] sm:$0xff]  ;;  %v15_v1 = vld [vmem:[%s513_s0 + $0x8] sm:$0xff]  ;;  %v16_v2 = vld [vmem:[%s513_s0 + $0x10] sm:$0xff]  ;;  %110 = vmatprep.mubr.f32.mxu0 %v360_v8  ;;  %vm224_vm2 = vcmask 33816   ;;  %vm235_vm3 = vcmask 9216   ;;  %s367_s4 = smov 126  }
   0x2   :  { %v18_v3 = vadd.f32 %v15_v1, %v14_v0  ;;  %v17_v4 = vld [vmem:[%s513_s0 + $0x18] sm:$0xff]  ;;  %v28_v6 = vld [vmem:[%s514_s1 + $0x8] sm:$0xff]  ;;  %v27_v7 = vld [vmem:[%s514_s1] sm:$0xff]  ;;  %v32_v55 = vand.u32 127, %v31_v54  ;;  %v34_v56 = vshrl.u32 %v31_v54, 7  ;;  %s366_s1 = smov 123  }
   0x3   :  { %v21_v5 = vadd.f32 %v17_v4, %v16_v2  ;;  %46 = vmatprep.subr.mxu0 %v28_v6  ;;  %v133_v9 = vld [vmem:[%s515_s2 + $0x80] sm:$0xff]  ;;  %v134_v10 = vld [vmem:[%s515_s2 + $0x88] sm:$0xff]  ;;  %v135_v14 = vld [vmem:[%s515_s2 + $0x90] sm:$0xff]  ;;  %vm261_vm4 = vcmask 17408   ;;  %vm266_vm5 = vcmask 42008   ;;  %vm271_vm6 = vcmask 66608  }
   0x4   :  { %19 = vadd.xlane.f32.xlu0 %v18_v3  ;;  %47 = vmatpush1.msra.mxu0 %v27_v7  ;;  %v117_v11 = vld [vmem:[%s515_s2] sm:$0xff]  ;;  %v313_v12 = vpack.c.bf16 %v134_v10, %v133_v9  ;;  %v118_v13 = vld [vmem:[%s515_s2 + $0x8] sm:$0xff]  ;;  %v136_v15 = vld [vmem:[%s515_s2 + $0x98] sm:$0xff]  ;;  %v35_v58 = vsub.s32 %v32_v55, %v34_v56 }
   0x5   :  { %v315_v16 = vpack.c.bf16 %v118_v13, %v117_v11  ;;  %v317_v17 = vpack.c.bf16 %v136_v15, %v135_v14  ;;  %v119_v18 = vld [vmem:[%s515_s2 + $0x10] sm:$0xff]  ;;  %v120_v19 = vld [vmem:[%s515_s2 + $0x18] sm:$0xff]  ;;  %v137_v20 = vld [vmem:[%s515_s2 + $0xa0] sm:$0xff] }
   0x6   :  { %314 = vmatprep.subr.bf16.mxu1 %v313_v12  ;;  %v138_v21 = vld [vmem:[%s515_s2 + $0xa8] sm:$0xff]  ;;  %v319_v22 = vpack.c.bf16 %v120_v19, %v119_v18  ;;  %v121_v24 = vld [vmem:[%s515_s2 + $0x20] sm:$0xff]  ;;  %v139_v26 = vld [vmem:[%s515_s2 + $0xb0] sm:$0xff]  ;;  %v363_v18 = vmov 4  }
   0x7   :  { %316 = vmatpush3.bf16.msra.mxu1 %v315_v16  ;;  %v321_v23 = vpack.c.bf16 %v138_v21, %v137_v20  ;;  %v122_v25 = vld [vmem:[%s515_s2 + $0x28] sm:$0xff]  ;;  %v140_v27 = vld [vmem:[%s515_s2 + $0xb8] sm:$0xff]  ;;  %v123_v30 = vld [vmem:[%s515_s2 + $0x30] sm:$0xff]  ;;  %353 = vset.pattern.permute.xlu1 %v363_v18 }
   0x8   :  { %22 = vadd.xlane.f32.xlu0 %v21_v5  ;;  %318 = vmatprep.subr.bf16.mxu1 %v317_v17  ;;  %v323_v28 = vpack.c.bf16 %v122_v25, %v121_v24  ;;  %v325_v29 = vpack.c.bf16 %v140_v27, %v139_v26  ;;  %v124_v31 = vld [vmem:[%s515_s2 + $0x38] sm:$0xff]  ;;  %v141_v32 = vld [vmem:[%s515_s2 + $0xc0] sm:$0xff]  ;;  %v142_v33 = vld [vmem:[%s515_s2 + $0xc8] sm:$0xff] }
   0x9   :  { %v327_v34 = vpack.c.bf16 %v124_v31, %v123_v30  ;;  %v329_v35 = vpack.c.bf16 %v142_v33, %v141_v32  ;;  %v125_v36 = vld [vmem:[%s515_s2 + $0x40] sm:$0xff]  ;;  %v126_v37 = vld [vmem:[%s515_s2 + $0x48] sm:$0xff]  ;;  %v143_v38 = vld [vmem:[%s515_s2 + $0xd0] sm:$0xff]  ;;  %355 = vset.pattern.permute.xlu0 %v363_v18 }
   0xa   :  { %v144_v39 = vld [vmem:[%s515_s2 + $0xd8] sm:$0xff]  ;;  %v331_v40 = vpack.c.bf16 %v126_v37, %v125_v36  ;;  %v127_v42 = vld [vmem:[%s515_s2 + $0x50] sm:$0xff]  ;;  %v145_v44 = vld [vmem:[%s515_s2 + $0xe0] sm:$0xff] }
   0xb   :  { %320 = vmatpush3.bf16.msra.mxu1 %v319_v22  ;;  %v333_v41 = vpack.c.bf16 %v144_v39, %v143_v38  ;;  %v128_v43 = vld [vmem:[%s515_s2 + $0x58] sm:$0xff]  ;;  %v146_v45 = vld [vmem:[%s515_s2 + $0xe8] sm:$0xff]  ;;  %v129_v48 = vld [vmem:[%s515_s2 + $0x60] sm:$0xff]  ;;  %v364_v22 = vmov 3  }
   0xc   :  { %322 = vmatprep.subr.bf16.mxu1 %v321_v23  ;;  %v335_v46 = vpack.c.bf16 %v128_v43, %v127_v42  ;;  %v337_v47 = vpack.c.bf16 %v146_v45, %v145_v44  ;;  %v130_v49 = vld [vmem:[%s515_s2 + $0x68] sm:$0xff]  ;;  %v147_v50 = vld [vmem:[%s515_s2 + $0xf0] sm:$0xff]  ;;  %v148_v51 = vld [vmem:[%s515_s2 + $0xf8] sm:$0xff] }
   0xd   :  { %v339_v52 = vpack.c.bf16 %v130_v49, %v129_v48  ;;  %v341_v53 = vpack.c.bf16 %v148_v51, %v147_v50  ;;  %v131_v1 = vld [vmem:[%s515_s2 + $0x70] sm:$0xff]  ;;  %v132_v2 = vld [vmem:[%s515_s2 + $0x78] sm:$0xff]  ;;  %s362_s2 = smov 125  }
   0xe   :  { %v343_v3 = vpack.c.bf16 %v132_v2, %v131_v1 }
   0xf   :  { %324 = vmatpush3.bf16.msra.mxu1 %v323_v28 }
  0x10   :  { %326 = vmatprep.subr.bf16.mxu1 %v325_v29 }
  0x13   :  { %328 = vmatpush3.bf16.msra.mxu1 %v327_v34 }
  0x14   :  { %330 = vmatprep.subr.bf16.mxu1 %v329_v35 }
  0x17   :  { %332 = vmatpush3.bf16.msra.mxu1 %v331_v40 }
  0x18   :  { %334 = vmatprep.subr.bf16.mxu1 %v333_v41 }
  0x1b   :  { %336 = vmatpush3.bf16.msra.mxu1 %v335_v46 }
  0x1c   :  { %338 = vmatprep.subr.bf16.mxu1 %v337_v47 }
  0x1f   :  { %340 = vmatpush3.bf16.msra.mxu1 %v339_v52 }
  0x20   :  { %342 = vmatprep.subr.bf16.mxu1 %v341_v53 }
  0x23   :  { %344 = vmatpush3.bf16.msra.mxu1 %v343_v3 }
  0x91   :  { %v20_v57 = vpop.xlane.xlu0 %19 }
  0x92   :  { %v25_v59 = vmul.f32 0.00390625, %v20_v57 }
  0x94   :  { %v36_v62 = vrot.slane %v25_v59, %v35_v58 }
  0x95   :  { %v23_v60 = vpop.xlane.xlu0 %22 }
  0x96   :  { %v26_v61 = vmul.f32 0.00390625, %v23_v60 }
  0x98   :  { %v40_v63 = vrot.slane %v26_v61, %v35_v58 }
  0x9a   :  { %v42_v0 = vsel %vm41_vm0, %v40_v63, %v36_v62 }
  0x9b   :  { %277 = vmatmul.mubr.msk.f32.vlgmr.msra.gmra.mrb[0].mxu0 %vm43_vm1, %v42_v0 }
 0x16e   :  { %v112_v4 = vpop.f32.mrb[0].mxu0 }
 0x16f   :  { %v114_v5 = vpop.f32.mrb[1].mxu0 }
 0x170   :  { %213 = vmatprep.mubr.f32.mxu1 %v114_v5 }
 0x171   :  { %214 = vmatmul.mubr.f32.vlgmr.msra.gmra.mrb[0].mxu1 %v112_v4 }
 0x244   :  { %v310_v6 = vpop.f32.mrb[0].mxu1 }
 0x245   :  { %v311_v7 = vpop.f32.mrb[1].mxu1 }
 0x246   :  { %v312_v8 = vadd.f32 %v311_v7, %v310_v6 }
 0x248   :  { %220 = vrot.lane.b32.xlu1 %v312_v8, %s361_s29 }
 0x2ba   :  { %v221_v9 = vpop.permute.xlu1 %220 }
 0x2bb   :  { %v223_v10 = vadd.f32 %v312_v8, %v221_v9 }
 0x2bd   :  { %v225_v11 = vsel %vm224_vm2, %v223_v10, -inf }
 0x2be   :  { %226 = vmax.xlane.f32.xlu1 %v225_v11 }
 0x34b   :  { %v227_v12 = vpop.xlane.xlu1 %226 }
 0x34c   :  { %v228_v13 = vsub.f32 %v223_v10, %v227_v12 }
 0x34e   :  { %v229_v14 = vmul.f32 1.442695, %v228_v13 }
 0x350   :  { %356 = vpow2.f32 %v229_v14 }
 0x35a   :  { %v357_v15 = vpop.eup %356 }
 0x35b   :  { %232 = vrot.lane.b32.xlu0 %v357_v15, %s362_s2 }
 0x3cd   :  { %v233_v16 = vpop.permute.xlu0 %232 }
 0x3ce   :  { %v236_v17 = vsel %vm235_vm3, %v233_v16, 0.0 }
 0x3cf   :  { %237 = vadd.xlane.f32.xlu0 %v236_v17 }
 0x45c   :  { %v238_v19 = vpop.xlane.xlu0 %237 }
 0x45d   :  { %358 = vrcp.f32 %v238_v19 }
 0x467   :  { %v359_v20 = vpop.eup %358 }
 0x468   :  { %v240_v21 = vmul.f32 %v359_v20, %v357_v15 }
 0x46a   :  { %248 = vperm.xlu1 %353, %v240_v21  }
 0x46e   :  { %354 = vset.pattern.permute.xlu1 %v364_v22 }
 0x46f   :  { %243 = vperm.xlu1 %354, %v240_v21  }
 0x473   :  { %263 = vrot.lane.b32.xlu1 %v312_v8, %s365_s30 }
 0x4e9   :  { %v249_v23 = vpop.permute.xlu1 %248 }
 0x4ea   :  { %v251_v24 = vmul.f32 %v312_v8, %v249_v23 }
 0x4ec   :  { %253 = vrot.lane.b32.xlu0 %v251_v24, %s361_s29 }
 0x4ee   :  { %v244_v25 = vpop.permute.xlu1 %243 }
 0x4ef   :  { %v246_v26 = vmul.f32 %v312_v8, %v244_v25 }
 0x4f2   :  { %v264_v29 = vpop.permute.xlu1 %263 }
 0x55e   :  { %v254_v27 = vpop.permute.xlu0 %253 }
 0x55f   :  { %v256_v28 = vadd.f32 %v254_v27, %v246_v26 }
 0x561   :  { %258 = vrot.lane.b32.xlu1 %v256_v28, %s366_s1 }
 0x565   :  { %268 = vrot.lane.b32.xlu1 %v312_v8, %s367_s4 }
 0x5d3   :  { %v259_v30 = vpop.permute.xlu1 %258 }
 0x5d4   :  { %262 = vst.msk [vmem:[%s516_s3] sm:$0x3] %vm261_vm4, %v259_v30 }
 0x5d5   :  { %267 = vst.msk [vmem:[%s516_s3] sm:$0x3] %vm266_vm5, %v264_v29 }
 0x5d7   :  { %v269_v31 = vpop.permute.xlu1 %268 }
 0x5d8   :  { %272 = vst.msk [vmem:[%s516_s3] sm:$0x3] %vm271_vm6, %v269_v31 }

</bundles_post_ra>
